<compile_context>
chip_gen: v5e
topology: v5e:2x2
jax: 0.10.0
libtpu: 0.0.40
codegen_flags: <defaults>
</compile_context>

<pallas_src>
import functools

import jax
import jax.numpy as jnp
from jax import lax
from jax.experimental import pallas as pl
from jax.experimental.pallas import tpu as pltpu


# Tap offsets (dy-1, dx-1); tap-major order matches the im2col weight layout.
_TAPS = tuple((dy - 1, dx - 1) for dy in range(3) for dx in range(3))
_CENTER_TAP = 4                      # offset (0, 0): no shift, no boundary mask


def _round_up(n, m):
    return (n + m - 1) // m * m


def _default_grid_steps(batch):
    """v7x has 2 TensorCores -> shard the batch across 2 parallel grid steps;
    v5e/v6e have 1 TC, where one big lane-dense slab minimizes grid overhead."""
    try:
        kind = jax.devices()[0].device_kind.lower()
    except Exception:
        kind = ""
    if "v7" in kind and batch >= 2 and batch % 2 == 0:
        return 2
    return 1


def _make_masks(H, W, n_cols, dtype):
    """(9, n_cols) 0/1 tap-validity masks implementing zero padding.  Columns
    are taken modulo H*W so image seams in the lane-concatenated batch slab
    are zeroed exactly like frame boundaries."""
    col = jnp.arange(n_cols, dtype=jnp.int32) % (H * W)
    yy = col // W
    xx = col % W
    rows = []
    for ry, rx in _TAPS:
        m = jnp.ones((n_cols,), jnp.bool_)
        if ry < 0:
            m = jnp.logical_and(m, yy >= -ry)
        if ry > 0:
            m = jnp.logical_and(m, yy < H - ry)
        if rx < 0:
            m = jnp.logical_and(m, xx >= -rx)
        if rx > 0:
            m = jnp.logical_and(m, xx < W - rx)
        rows.append(m)
    return jnp.stack(rows, axis=0).astype(dtype)


def _shift_flat(v, d, n):
    """s[:, p] = v[:, p + d] for 0 <= p + d < n, else 0 (zero fill)."""
    if d == 0:
        return v
    c = v.shape[0]
    z = jnp.zeros((c, abs(d)), v.dtype)
    if d > 0:
        return jnp.concatenate([v[:, d:], z], axis=1)
    return jnp.concatenate([z, v[:, :n + d]], axis=1)


def _im2col(v, masks, img_w, n):
    """(Cpad, n) -> (9*Cpad, n) patch matrix, tap-major then channel.  Cpad is
    a multiple of 8, so every tap chunk is a full sublane group (aligned vreg
    copies in the concat, no partial-store shuffles)."""
    parts = []
    for t, (ry, rx) in enumerate(_TAPS):
        d = ry * img_w + rx
        s = _shift_flat(v, d, n)
        if t != _CENTER_TAP:
            s = s * masks[t:t + 1, :]        # zero out-of-frame / cross-image taps
        parts.append(s)
    return jnp.concatenate(parts, axis=0)


def _residual_doubleconv_kernel(x_ref, m_ref, w1_ref, w2_ref, o_ref, *, img_w):
    x = x_ref[...]                 # (Cin_pad, n): lane-dense, last row == 1.0
    masks = m_ref[...]             # (9, n) precomputed boundary masks
    n = x.shape[-1]

    # conv1 + BN1 (scale folded into w1; shift rides the constant-ones row)
    p1 = _im2col(x, masks, img_w, n)                  # (9*Cin_pad, n)
    h1 = jnp.maximum(
        jnp.dot(w1_ref[...], p1, preferred_element_type=jnp.float32), 0.0)
    # w1's spare output channel re-emits the ones row, so h1[-1] == 1.0 and
    # conv2's BN shift also rides the MXU (no VPU bias broadcast/add).

    # conv2 + BN2
    p2 = _im2col(h1, masks, img_w, n)                 # (9*Cmid_pad, n)
    h2 = jnp.maximum(
        jnp.dot(w2_ref[...], p2, preferred_element_type=jnp.float32), 0.0)

    # residual add from the same lane-dense input block
    o_ref[...] = (x + h2).astype(o_ref.dtype)


def _prep_weight(w_hwio, scale, shift, cin_pad, cout_pad, carry_ones):
    """(3,3,Cin,Cout) HWIO conv weight with BN scale folded, channels padded
    to (cin_pad, cout_pad) -> (cout_pad, 9*cin_pad) im2col weight.  The BN
    shift goes in the column multiplying the constant-ones input row (center
    tap, last padded input channel).  If carry_ones, the last padded output
    channel re-emits that ones row for the next conv's shift."""
    kh, kw, cin, cout = w_hwio.shape
    w = w_hwio * scale[None, None, None, :]
    wp = jnp.zeros((kh, kw, cin_pad, cout_pad), w.dtype)
    wp = wp.at[:, :, :cin, :cout].set(w)
    wk = jnp.transpose(wp, (3, 0, 1, 2)).reshape(cout_pad, kh * kw * cin_pad)
    bias_col = _CENTER_TAP * cin_pad + (cin_pad - 1)
    wk = wk.at[:cout, bias_col].set(shift)
    if carry_ones:
        wk = wk.at[cout_pad - 1, bias_col].set(jnp.asarray(1.0, wk.dtype))
    return wk


def residual_connection_nchw(x_nchw, w1, w2, s1, b1, s2, b2,
                             num_grid_steps=None):
    """PyTorch-facing wrapper: NCHW in, NCHW out.  w*: HWIO conv weights,
    s*/b*: eval-mode BatchNorm folded scale/shift, ReLU activation."""
    B, C, H, W = x_nchw.shape
    Cmid = w1.shape[3]
    Cout = w2.shape[3]
    assert C == Cout, "residual add requires in_channels == out_channels"
    HW = H * W

    # Pad channels to full sublane groups plus one spare channel carrying the
    # constant-ones row (BN-shift-on-MXU trick).
    cin_pad = _round_up(C + 1, 8)
    cmid_pad = _round_up(Cmid + 1, 8)
    cout_pad = cin_pad                      # must match x's padding for x + h2

    G = num_grid_steps or _default_grid_steps(B)
    if B % G != 0 or ((B // G) * HW) % 128 != 0:
        G = 1                               # fall back to one lane-dense slab
    n_per = (B // G) * HW

    # Lane-dense slab: images concatenated along the lane axis -> (Cpad, B*HW).
    xf = jnp.transpose(x_nchw, (1, 0, 2, 3)).reshape(C, B * HW)
    xf = jnp.concatenate(
        [xf,
         jnp.zeros((cin_pad - 1 - C, B * HW), xf.dtype),
         jnp.ones((1, B * HW), xf.dtype)], axis=0)

    w1k = _prep_weight(w1, s1, b1, cin_pad, cmid_pad, carry_ones=True)
    w2k = _prep_weight(w2, s2, b2, cmid_pad, cout_pad, carry_ones=False)
    masks = _make_masks(H, W, n_per, xf.dtype)

    # TODO(synk): for large H*W (e.g. 224x224 UNet stages) add a spatial grid
    # axis with a 2-row halo in the index_map; size tiles for v7x's 64 MiB
    # VMEM counting the 9x im2col blowup (live set ~ (1+9+1)*C*HW_tile*4B +
    # (9+1)*Cmid*HW_tile*4B, x2 for double buffering) or raise
    # vmem_limit_bytes per generation.
    kernel = functools.partial(_residual_doubleconv_kernel, img_w=W)
    out = pl.pallas_call(
        kernel,
        out_shape=jax.ShapeDtypeStruct((cout_pad, B * HW), x_nchw.dtype),
        grid_spec=pltpu.PrefetchScalarGridSpec(
            num_scalar_prefetch=0,
            grid=(G,),
            in_specs=[
                pl.BlockSpec((cin_pad, n_per), lambda b: (0, b)),
                pl.BlockSpec((9, n_per), lambda b: (0, 0)),
                pl.BlockSpec((cmid_pad, 9 * cin_pad), lambda b: (0, 0)),
                pl.BlockSpec((cout_pad, 9 * cmid_pad), lambda b: (0, 0)),
            ],
            out_specs=pl.BlockSpec((cout_pad, n_per), lambda b: (0, b)),
        ),
        compiler_params=pltpu.CompilerParams(
            dimension_semantics=("parallel",)),
    )(xf, masks, w1k, w2k)

    out = out[:C].reshape(C, B, H, W)
    return jnp.transpose(out, (1, 0, 2, 3))


def fold_bn(gamma, beta, mean, var, eps=1e-5):
    scale = gamma / jnp.sqrt(var + eps)
    shift = beta - mean * scale
    return scale, shift


def reference_nhwc(x, w1, w2, s1, b1, s2, b2):
    dn = ("NHWC", "HWIO", "NHWC")
    h = lax.conv_general_dilated(x, w1, (1, 1), ((1, 1), (1, 1)),
                                 dimension_numbers=dn,
                                 precision=lax.Precision.HIGHEST)
    h = jnp.maximum(h * s1 + b1, 0.0)
    h = lax.conv_general_dilated(h, w2, (1, 1), ((1, 1), (1, 1)),
                                 dimension_numbers=dn,
                                 precision=lax.Precision.HIGHEST)
    h = jnp.maximum(h * s2 + b2, 0.0)
    return x + h


if __name__ == "__main__":
    B, C, H, W = 2, 4, 16, 16          # in_channels == out_channels == 4
    Cmid = C                            # DoubleConvolution default: mid = out

    key = jax.random.PRNGKey(0)
    k = jax.random.split(key, 8)
    x_nchw = jax.random.normal(k[0], (B, C, H, W), jnp.float32)

    # Conv weights in HWIO layout (deterministic synthetic init).
    w1 = jax.random.normal(k[1], (3, 3, C, Cmid), jnp.float32) * 0.2
    w2 = jax.random.normal(k[2], (3, 3, Cmid, C), jnp.float32) * 0.2

    # BatchNorm (eval-mode) parameters, folded into scale/shift.
    g1 = 1.0 + 0.1 * jax.random.normal(k[3], (Cmid,), jnp.float32)
    be1 = 0.1 * jax.random.normal(k[4], (Cmid,), jnp.float32)
    g2 = 1.0 + 0.1 * jax.random.normal(k[5], (C,), jnp.float32)
    be2 = 0.1 * jax.random.normal(k[6], (C,), jnp.float32)
    m1 = jnp.zeros((Cmid,), jnp.float32)
    v1 = jnp.ones((Cmid,), jnp.float32)
    m2 = jnp.zeros((C,), jnp.float32)
    v2 = jnp.ones((C,), jnp.float32)
    s1, b1 = fold_bn(g1, be1, m1, v1)
    s2, b2 = fold_bn(g2, be2, m2, v2)

    out = residual_connection_nchw(x_nchw, w1, w2, s1, b1, s2, b2)
    out = jax.block_until_ready(out)

    # correctness check against a pure-JAX reference
    x_nhwc = jnp.transpose(x_nchw, (0, 2, 3, 1))
    ref = jnp.transpose(reference_nhwc(x_nhwc, w1, w2, s1, b1, s2, b2),
                        (0, 3, 1, 2))
    assert out.shape == x_nchw.shape
    err = float(jnp.max(jnp.abs(out - ref)))
    assert err < 2e-4, f"mismatch vs reference: {err}"

    print("KERNEL_OK")
</pallas_src>

<mosaic_0001>
module attributes {stable_mosaic.version = 11 : i64} {
  func.func @_residual_doubleconv_kernel(%arg0: i32, %arg1: memref<8x512xf32, #tpu.memory_space<vmem>>, %arg2: memref<9x512xf32, #tpu.memory_space<vmem>>, %arg3: memref<8x72xf32, #tpu.memory_space<vmem>>, %arg4: memref<8x72xf32, #tpu.memory_space<vmem>>, %arg5: memref<8x512xf32, #tpu.memory_space<vmem>>) attributes {dimension_semantics = [#tpu.dimension_semantics<parallel>], iteration_bounds = array<i64: 1>, scalar_prefetch = 0 : i64, scratch_operands = 0 : i64, tpu.core_type = #tpu.core_type<tc>, window_params = [{transform_indices = @transform_0, window_bounds = array<i64: 8, 512>}, {pipeline_mode = #tpu.pipeline_mode<synchronous>, transform_indices = @transform_1, window_bounds = array<i64: 9, 512>}, {pipeline_mode = #tpu.pipeline_mode<synchronous>, transform_indices = @transform_2, window_bounds = array<i64: 8, 72>}, {pipeline_mode = #tpu.pipeline_mode<synchronous>, transform_indices = @transform_3, window_bounds = array<i64: 8, 72>}, {transform_indices = @transform_4, window_bounds = array<i64: 8, 512>}]} {
    %c0 = arith.constant 0 : index
    %c0_0 = arith.constant 0 : index
    %0 = vector.load %arg1[%c0, %c0_0] : memref<8x512xf32, #tpu.memory_space<vmem>>, vector<8x512xf32>
    %c0_1 = arith.constant 0 : index
    %c0_2 = arith.constant 0 : index
    %1 = vector.load %arg2[%c0_1, %c0_2] : memref<9x512xf32, #tpu.memory_space<vmem>>, vector<9x512xf32>
    %cst = arith.constant 0.000000e+00 : f32
    %2 = vector.broadcast %cst : f32 to vector<8x17xf32>
    %3 = vector.extract_strided_slice %0 {offsets = [0, 0], sizes = [8, 495], strides = [1, 1]} : vector<8x512xf32> to vector<8x495xf32>
    %4 = tpu.concatenate %2, %3 in 1 : vector<8x17xf32>, vector<8x495xf32> -> vector<8x512xf32>
    %5 = vector.extract_strided_slice %1 {offsets = [0, 0], sizes = [1, 512], strides = [1, 1]} : vector<9x512xf32> to vector<1x512xf32>
    %6 = vector.broadcast %5 : vector<1x512xf32> to vector<8x512xf32>
    %7 = arith.mulf %4, %6 : vector<8x512xf32>
    %cst_3 = arith.constant 0.000000e+00 : f32
    %8 = vector.broadcast %cst_3 : f32 to vector<8x16xf32>
    %9 = vector.extract_strided_slice %0 {offsets = [0, 0], sizes = [8, 496], strides = [1, 1]} : vector<8x512xf32> to vector<8x496xf32>
    %10 = tpu.concatenate %8, %9 in 1 : vector<8x16xf32>, vector<8x496xf32> -> vector<8x512xf32>
    %11 = vector.extract_strided_slice %1 {offsets = [1, 0], sizes = [1, 512], strides = [1, 1]} : vector<9x512xf32> to vector<1x512xf32>
    %12 = vector.broadcast %11 : vector<1x512xf32> to vector<8x512xf32>
    %13 = arith.mulf %10, %12 : vector<8x512xf32>
    %cst_4 = arith.constant 0.000000e+00 : f32
    %14 = vector.broadcast %cst_4 : f32 to vector<8x15xf32>
    %15 = vector.extract_strided_slice %0 {offsets = [0, 0], sizes = [8, 497], strides = [1, 1]} : vector<8x512xf32> to vector<8x497xf32>
    %16 = tpu.concatenate %14, %15 in 1 : vector<8x15xf32>, vector<8x497xf32> -> vector<8x512xf32>
    %17 = vector.extract_strided_slice %1 {offsets = [2, 0], sizes = [1, 512], strides = [1, 1]} : vector<9x512xf32> to vector<1x512xf32>
    %18 = vector.broadcast %17 : vector<1x512xf32> to vector<8x512xf32>
    %19 = arith.mulf %16, %18 : vector<8x512xf32>
    %cst_5 = arith.constant 0.000000e+00 : f32
    %20 = vector.broadcast %cst_5 : f32 to vector<8x1xf32>
    %21 = vector.extract_strided_slice %0 {offsets = [0, 0], sizes = [8, 511], strides = [1, 1]} : vector<8x512xf32> to vector<8x511xf32>
    %22 = tpu.concatenate %20, %21 in 1 : vector<8x1xf32>, vector<8x511xf32> -> vector<8x512xf32>
    %23 = vector.extract_strided_slice %1 {offsets = [3, 0], sizes = [1, 512], strides = [1, 1]} : vector<9x512xf32> to vector<1x512xf32>
    %24 = vector.broadcast %23 : vector<1x512xf32> to vector<8x512xf32>
    %25 = arith.mulf %22, %24 : vector<8x512xf32>
    %cst_6 = arith.constant 0.000000e+00 : f32
    %26 = vector.broadcast %cst_6 : f32 to vector<8x1xf32>
    %27 = vector.extract_strided_slice %0 {offsets = [0, 1], sizes = [8, 511], strides = [1, 1]} : vector<8x512xf32> to vector<8x511xf32>
    %28 = tpu.concatenate %27, %26 in 1 : vector<8x511xf32>, vector<8x1xf32> -> vector<8x512xf32>
    %29 = vector.extract_strided_slice %1 {offsets = [5, 0], sizes = [1, 512], strides = [1, 1]} : vector<9x512xf32> to vector<1x512xf32>
    %30 = vector.broadcast %29 : vector<1x512xf32> to vector<8x512xf32>
    %31 = arith.mulf %28, %30 : vector<8x512xf32>
    %cst_7 = arith.constant 0.000000e+00 : f32
    %32 = vector.broadcast %cst_7 : f32 to vector<8x15xf32>
    %33 = vector.extract_strided_slice %0 {offsets = [0, 15], sizes = [8, 497], strides = [1, 1]} : vector<8x512xf32> to vector<8x497xf32>
    %34 = tpu.concatenate %33, %32 in 1 : vector<8x497xf32>, vector<8x15xf32> -> vector<8x512xf32>
    %35 = vector.extract_strided_slice %1 {offsets = [6, 0], sizes = [1, 512], strides = [1, 1]} : vector<9x512xf32> to vector<1x512xf32>
    %36 = vector.broadcast %35 : vector<1x512xf32> to vector<8x512xf32>
    %37 = arith.mulf %34, %36 : vector<8x512xf32>
    %cst_8 = arith.constant 0.000000e+00 : f32
    %38 = vector.broadcast %cst_8 : f32 to vector<8x16xf32>
    %39 = vector.extract_strided_slice %0 {offsets = [0, 16], sizes = [8, 496], strides = [1, 1]} : vector<8x512xf32> to vector<8x496xf32>
    %40 = tpu.concatenate %39, %38 in 1 : vector<8x496xf32>, vector<8x16xf32> -> vector<8x512xf32>
    %41 = vector.extract_strided_slice %1 {offsets = [7, 0], sizes = [1, 512], strides = [1, 1]} : vector<9x512xf32> to vector<1x512xf32>
    %42 = vector.broadcast %41 : vector<1x512xf32> to vector<8x512xf32>
    %43 = arith.mulf %40, %42 : vector<8x512xf32>
    %cst_9 = arith.constant 0.000000e+00 : f32
    %44 = vector.broadcast %cst_9 : f32 to vector<8x17xf32>
    %45 = vector.extract_strided_slice %0 {offsets = [0, 17], sizes = [8, 495], strides = [1, 1]} : vector<8x512xf32> to vector<8x495xf32>
    %46 = tpu.concatenate %45, %44 in 1 : vector<8x495xf32>, vector<8x17xf32> -> vector<8x512xf32>
    %47 = vector.extract_strided_slice %1 {offsets = [8, 0], sizes = [1, 512], strides = [1, 1]} : vector<9x512xf32> to vector<1x512xf32>
    %48 = vector.broadcast %47 : vector<1x512xf32> to vector<8x512xf32>
    %49 = arith.mulf %46, %48 : vector<8x512xf32>
    %50 = tpu.concatenate %7, %13, %19, %25, %0, %31, %37, %43, %49 in 0 : vector<8x512xf32>, vector<8x512xf32>, vector<8x512xf32>, vector<8x512xf32>, vector<8x512xf32>, vector<8x512xf32>, vector<8x512xf32>, vector<8x512xf32>, vector<8x512xf32> -> vector<72x512xf32>
    %c0_10 = arith.constant 0 : index
    %c0_11 = arith.constant 0 : index
    %51 = vector.load %arg3[%c0_10, %c0_11] : memref<8x72xf32, #tpu.memory_space<vmem>>, vector<8x72xf32>
    %cst_12 = arith.constant dense<0.000000e+00> : vector<8x512xf32>
    %52 = tpu.matmul %51, %50, %cst_12 {dimension_numbers = #tpu.dot_dimension_numbers<[1], [0], [0], [1], [0, 0, 1, 1], [], []>} : vector<8x72xf32>, vector<72x512xf32>, vector<8x512xf32> -> vector<8x512xf32>
    %cst_13 = arith.constant 0.000000e+00 : f32
    %53 = vector.broadcast %cst_13 : f32 to vector<8x512xf32>
    %54 = arith.maximumf %52, %53 : vector<8x512xf32>
    %cst_14 = arith.constant 0.000000e+00 : f32
    %55 = vector.broadcast %cst_14 : f32 to vector<8x17xf32>
    %56 = vector.extract_strided_slice %54 {offsets = [0, 0], sizes = [8, 495], strides = [1, 1]} : vector<8x512xf32> to vector<8x495xf32>
    %57 = tpu.concatenate %55, %56 in 1 : vector<8x17xf32>, vector<8x495xf32> -> vector<8x512xf32>
    %58 = vector.extract_strided_slice %1 {offsets = [0, 0], sizes = [1, 512], strides = [1, 1]} : vector<9x512xf32> to vector<1x512xf32>
    %59 = vector.broadcast %58 : vector<1x512xf32> to vector<8x512xf32>
    %60 = arith.mulf %57, %59 : vector<8x512xf32>
    %cst_15 = arith.constant 0.000000e+00 : f32
    %61 = vector.broadcast %cst_15 : f32 to vector<8x16xf32>
    %62 = vector.extract_strided_slice %54 {offsets = [0, 0], sizes = [8, 496], strides = [1, 1]} : vector<8x512xf32> to vector<8x496xf32>
    %63 = tpu.concatenate %61, %62 in 1 : vector<8x16xf32>, vector<8x496xf32> -> vector<8x512xf32>
    %64 = vector.extract_strided_slice %1 {offsets = [1, 0], sizes = [1, 512], strides = [1, 1]} : vector<9x512xf32> to vector<1x512xf32>
    %65 = vector.broadcast %64 : vector<1x512xf32> to vector<8x512xf32>
    %66 = arith.mulf %63, %65 : vector<8x512xf32>
    %cst_16 = arith.constant 0.000000e+00 : f32
    %67 = vector.broadcast %cst_16 : f32 to vector<8x15xf32>
    %68 = vector.extract_strided_slice %54 {offsets = [0, 0], sizes = [8, 497], strides = [1, 1]} : vector<8x512xf32> to vector<8x497xf32>
    %69 = tpu.concatenate %67, %68 in 1 : vector<8x15xf32>, vector<8x497xf32> -> vector<8x512xf32>
    %70 = vector.extract_strided_slice %1 {offsets = [2, 0], sizes = [1, 512], strides = [1, 1]} : vector<9x512xf32> to vector<1x512xf32>
    %71 = vector.broadcast %70 : vector<1x512xf32> to vector<8x512xf32>
    %72 = arith.mulf %69, %71 : vector<8x512xf32>
    %cst_17 = arith.constant 0.000000e+00 : f32
    %73 = vector.broadcast %cst_17 : f32 to vector<8x1xf32>
    %74 = vector.extract_strided_slice %54 {offsets = [0, 0], sizes = [8, 511], strides = [1, 1]} : vector<8x512xf32> to vector<8x511xf32>
    %75 = tpu.concatenate %73, %74 in 1 : vector<8x1xf32>, vector<8x511xf32> -> vector<8x512xf32>
    %76 = vector.extract_strided_slice %1 {offsets = [3, 0], sizes = [1, 512], strides = [1, 1]} : vector<9x512xf32> to vector<1x512xf32>
    %77 = vector.broadcast %76 : vector<1x512xf32> to vector<8x512xf32>
    %78 = arith.mulf %75, %77 : vector<8x512xf32>
    %cst_18 = arith.constant 0.000000e+00 : f32
    %79 = vector.broadcast %cst_18 : f32 to vector<8x1xf32>
    %80 = vector.extract_strided_slice %54 {offsets = [0, 1], sizes = [8, 511], strides = [1, 1]} : vector<8x512xf32> to vector<8x511xf32>
    %81 = tpu.concatenate %80, %79 in 1 : vector<8x511xf32>, vector<8x1xf32> -> vector<8x512xf32>
    %82 = vector.extract_strided_slice %1 {offsets = [5, 0], sizes = [1, 512], strides = [1, 1]} : vector<9x512xf32> to vector<1x512xf32>
    %83 = vector.broadcast %82 : vector<1x512xf32> to vector<8x512xf32>
    %84 = arith.mulf %81, %83 : vector<8x512xf32>
    %cst_19 = arith.constant 0.000000e+00 : f32
    %85 = vector.broadcast %cst_19 : f32 to vector<8x15xf32>
    %86 = vector.extract_strided_slice %54 {offsets = [0, 15], sizes = [8, 497], strides = [1, 1]} : vector<8x512xf32> to vector<8x497xf32>
    %87 = tpu.concatenate %86, %85 in 1 : vector<8x497xf32>, vector<8x15xf32> -> vector<8x512xf32>
    %88 = vector.extract_strided_slice %1 {offsets = [6, 0], sizes = [1, 512], strides = [1, 1]} : vector<9x512xf32> to vector<1x512xf32>
    %89 = vector.broadcast %88 : vector<1x512xf32> to vector<8x512xf32>
    %90 = arith.mulf %87, %89 : vector<8x512xf32>
    %cst_20 = arith.constant 0.000000e+00 : f32
    %91 = vector.broadcast %cst_20 : f32 to vector<8x16xf32>
    %92 = vector.extract_strided_slice %54 {offsets = [0, 16], sizes = [8, 496], strides = [1, 1]} : vector<8x512xf32> to vector<8x496xf32>
    %93 = tpu.concatenate %92, %91 in 1 : vector<8x496xf32>, vector<8x16xf32> -> vector<8x512xf32>
    %94 = vector.extract_strided_slice %1 {offsets = [7, 0], sizes = [1, 512], strides = [1, 1]} : vector<9x512xf32> to vector<1x512xf32>
    %95 = vector.broadcast %94 : vector<1x512xf32> to vector<8x512xf32>
    %96 = arith.mulf %93, %95 : vector<8x512xf32>
    %cst_21 = arith.constant 0.000000e+00 : f32
    %97 = vector.broadcast %cst_21 : f32 to vector<8x17xf32>
    %98 = vector.extract_strided_slice %54 {offsets = [0, 17], sizes = [8, 495], strides = [1, 1]} : vector<8x512xf32> to vector<8x495xf32>
    %99 = tpu.concatenate %98, %97 in 1 : vector<8x495xf32>, vector<8x17xf32> -> vector<8x512xf32>
    %100 = vector.extract_strided_slice %1 {offsets = [8, 0], sizes = [1, 512], strides = [1, 1]} : vector<9x512xf32> to vector<1x512xf32>
    %101 = vector.broadcast %100 : vector<1x512xf32> to vector<8x512xf32>
    %102 = arith.mulf %99, %101 : vector<8x512xf32>
    %103 = tpu.concatenate %60, %66, %72, %78, %54, %84, %90, %96, %102 in 0 : vector<8x512xf32>, vector<8x512xf32>, vector<8x512xf32>, vector<8x512xf32>, vector<8x512xf32>, vector<8x512xf32>, vector<8x512xf32>, vector<8x512xf32>, vector<8x512xf32> -> vector<72x512xf32>
    %c0_22 = arith.constant 0 : index
    %c0_23 = arith.constant 0 : index
    %104 = vector.load %arg4[%c0_22, %c0_23] : memref<8x72xf32, #tpu.memory_space<vmem>>, vector<8x72xf32>
    %cst_24 = arith.constant dense<0.000000e+00> : vector<8x512xf32>
    %105 = tpu.matmul %104, %103, %cst_24 {dimension_numbers = #tpu.dot_dimension_numbers<[1], [0], [0], [1], [0, 0, 1, 1], [], []>} : vector<8x72xf32>, vector<72x512xf32>, vector<8x512xf32> -> vector<8x512xf32>
    %cst_25 = arith.constant 0.000000e+00 : f32
    %106 = vector.broadcast %cst_25 : f32 to vector<8x512xf32>
    %107 = arith.maximumf %105, %106 : vector<8x512xf32>
    %108 = arith.addf %0, %107 : vector<8x512xf32>
    %c0_26 = arith.constant 0 : index
    %c0_27 = arith.constant 0 : index
    %109 = vector.load %arg5[%c0_26, %c0_27] : memref<8x512xf32, #tpu.memory_space<vmem>>, vector<8x512xf32>
    tpu.vector_store %arg5[%c0_26, %c0_27], %108 {strides = array<i32>} : memref<8x512xf32, #tpu.memory_space<vmem>>, vector<8x512xf32>,
    return
  }
  func.func @transform_0(%arg0: i32) -> (i32, i32) {
    %c0_i32 = arith.constant 0 : i32
    %c0_i32_0 = arith.constant 0 : i32
    return %c0_i32, %arg0 : i32, i32
  }
  func.func @transform_1(%arg0: i32) -> (i32, i32) {
    %c0_i32 = arith.constant 0 : i32
    %c0_i32_0 = arith.constant 0 : i32
    %c0_i32_1 = arith.constant 0 : i32
    return %c0_i32, %c0_i32_0 : i32, i32
  }
  func.func @transform_2(%arg0: i32) -> (i32, i32) {
    %c0_i32 = arith.constant 0 : i32
    %c0_i32_0 = arith.constant 0 : i32
    %c0_i32_1 = arith.constant 0 : i32
    return %c0_i32, %c0_i32_0 : i32, i32
  }
  func.func @transform_3(%arg0: i32) -> (i32, i32) {
    %c0_i32 = arith.constant 0 : i32
    %c0_i32_0 = arith.constant 0 : i32
    %c0_i32_1 = arith.constant 0 : i32
    return %c0_i32, %c0_i32_0 : i32, i32
  }
  func.func @transform_4(%arg0: i32) -> (i32, i32) {
    %c0_i32 = arith.constant 0 : i32
    %c0_i32_0 = arith.constant 0 : i32
    return %c0_i32, %arg0 : i32, i32
  }
}

</mosaic_0001>

<bundles_post_ra>
// kernel: tpu_custom_call.1
= control target key start
LH: loop header
LB: loop body
LE: loop exit
PB: predicated region body
PF: predicated region fallthrough
CT: control target
= control target key end

     0   :  { %9 = vsyncpa [#allocation3], 0  ;;  %s1311_s0 = inlined_call_operand.hbm [shape: f32[8,512], index: 0, kind: input, shape index: {}]   ;;  %s1312_s1 = inlined_call_operand.hbm [shape: f32[9,512], index: 1, kind: input, shape index: {}]   ;;  %s1313_s2 = inlined_call_operand.hbm [shape: f32[8,72], index: 2, kind: input, shape index: {}]   ;;  %s1314_s3 = inlined_call_operand.hbm [shape: f32[8,72], index: 3, kind: input, shape index: {}]   ;;  %s1315_s4 = inlined_call_operand.hbm [shape: f32[8,512], index: 4, kind: output, shape index: {}]  }
   0x1   :  { %10 = vsyncpa [#allocation6], 0 }
   0x2   :  { %11 = vsyncpa [#allocation9], 0  ;;  %s28_s17 = sshll.u32 %s1312_s1, 4  ;;  %s29_s17 = int_to_ptr.hbm [resolvable:$true] %s28_s17 }
   0x3   :  { %12 = vsyncpa [#allocation4], 0  ;;  %s814_s18 = smov [#allocation5]   ;;  %s18_s22 = sshll.u32 %s1311_s0, 4  ;;  %s19_s22 = int_to_ptr.hbm [resolvable:$true] %s18_s22 }
   0x4   :  { %s30_s19 = sshll.u32 %s814_s18, 4  ;;  %s815_s23 = smov 512   ;;  %s31_s19 = int_to_ptr.vmem [resolvable:$true] %s30_s19 }
   0x5   :  { %s816_s24 = smov 32   ;;  %s817_s25 = smov [#allocation2]  }
   0x6   :  { %36 = dma.hbm_to_vmem [thread:$0]  %s29_s17, 1024, %s31_s19, [#allocation6], %s815_s23, %s815_s23, %s816_s24  }
   0x7   :  { %s20_s26 = sshll.u32 %s817_s25, 4  ;;  %s42_s29 = sshll.u32 %s1313_s2, 4  ;;  %s21_s26 = int_to_ptr.vmem [resolvable:$true] %s20_s26  ;;  %s43_s29 = int_to_ptr.hbm [resolvable:$true] %s42_s29 }
   0x8   :  { %23 = dma.hbm_to_vmem [thread:$0]  %s19_s22, 512, %s21_s26, [#allocation3]  }
   0x9   :  { %s53_s5 = sshll.u32 %s1314_s3, 4  ;;  %s818_s6 = smov [#allocation7]   ;;  %s54_s5 = int_to_ptr.hbm [resolvable:$true] %s53_s5 }
   0xa   :  { %s44_s7 = sshll.u32 %s818_s6, 4  ;;  %s819_s0 = smov [#allocation8]   ;;  %s45_s7 = int_to_ptr.vmem [resolvable:$true] %s44_s7 }
   0xb   :  { %47 = dma.hbm_to_vmem [thread:$0]  %s43_s29, 128, %s45_s7, [#allocation6]  }
   0xc   :  { %s55_s8 = sshll.u32 %s819_s0, 4  ;;  %s56_s8 = int_to_ptr.vmem [resolvable:$true] %s55_s8 }
   0xd   :  { %58 = dma.hbm_to_vmem [thread:$0]  %s54_s5, 128, %s56_s8, [#allocation9]  }
   0xe   :  { %806 = dma.done.wait [#allocation3], 512  }
   0xf   :  { %807 = vsyncadd [#allocation3], 4294966784 }
  0x10   :  { %808 = dma.done.wait [#allocation6], 1152  }
  0x11   :  { %809 = vsyncadd [#allocation6], 4294966144 }
  0x12   :  { %810 = dma.done.wait [#allocation9], 128  }
  0x13   :  { %811 = vsyncadd [#allocation9], 4294967168  ;;  %v866_v0 = vld [vmem:[#allocation2 + $0x10] sm:$0xff]  ;;  %s820_s2 = smov 113   ;;  %s821_s3 = smov 112   ;;  %v874_v1 = vld [vmem:[#allocation2 + $0x18] sm:$0xff] }
  0x14   :  { %220 = vrot.lane.b32.xlu2 %v866_v0, %s820_s2  ;;  %245 = vrot.lane.b32.xlu1 %v866_v0, %s821_s3  ;;  %s822_s9 = smov 111   ;;  %v882_v2 = vld [vmem:[#allocation2 + $0x8] sm:$0xff]  ;;  %s823_s10 = smov 127   ;;  %v896_v3 = vld [vmem:[#allocation2] sm:$0xff]  ;;  %v946_v9 = vld [vmem:[#allocation5 + $0x18] sm:$0xff]  ;;  %vm249_vm0 = vcmask 916480  }
  0x15   :  { %270 = vrot.lane.b32.xlu0 %v866_v0, %s822_s9  ;;  %s824_s11 = smov 1   ;;  %s825_s12 = smov 15   ;;  %vm274_vm1 = vcmask 908288   ;;  %v948_v10 = vld [vmem:[#allocation5 + $0x30] ss:$0 sm:$0xff]  ;;  %v261_v12 = vperm.slane %v946_v9, 7 }
  0x16   :  { %s826_s13 = smov 16   ;;  %s827_s14 = smov 17   ;;  %v950_v11 = vld [vmem:[#allocation5 + $0x38] ss:$0 sm:$0xff]  ;;  %v953_v14 = vld [vmem:[#allocation5 + $0x10] sm:$0xff]  ;;  %vm224_vm2 = vcmask 924672  }
  0x17   :  { %v260_v18 = vperm.slane %v953_v14, 7  ;;  %v236_v19 = vperm.slane %v946_v9, 6  ;;  %v235_v27 = vperm.slane %v953_v14, 6  ;;  %v211_v31 = vperm.slane %v946_v9, 5  ;;  %v1010_v58 = vld [vmem:[#allocation5 + $0x8] sm:$0xff]  ;;  %s828_s15 = smov [#allocation10]  }
  0x18   :  { %vm199_vm3 = vcmask 1039360   ;;  %v210_v33 = vperm.slane %v953_v14, 5  ;;  %vm174_vm4 = vcmask 7168   ;;  %v185_v41 = vperm.slane %v953_v14, 3  ;;  %v1013_v61 = vld [vmem:[#allocation5 + $0x20] ss:$0 sm:$0xff] }
  0x19   :  { %v186_v42 = vperm.slane %v946_v9, 3  ;;  %vm149_vm5 = vcmask 121856   ;;  %v160_v50 = vperm.slane %v953_v14, 2  ;;  %v161_v51 = vperm.slane %v946_v9, 2  ;;  %v1015_v62 = vld [vmem:[#allocation5 + $0x28] ss:$0 sm:$0xff] }
  0x1a   :  { %vm124_vm6 = vcmask 130048   ;;  %v135_v59 = vperm.slane %v953_v14, 1  ;;  %vm99_vm7 = vcmask 138240   ;;  %vm292_vm8 = vcmask 588800   ;;  %s645_s16 = sshll.u32 %s828_s15, 4  ;;  %s647_s19 = sshll.u32 %s1315_s4, 4  ;;  %s646_s16 = int_to_ptr.vmem [resolvable:$true] %s645_s16  ;;  %s648_s19 = int_to_ptr.hbm [resolvable:$true] %s647_s19 }
  0x1c   :  { %222 = vrot.lane.b32.xlu2 %v874_v1, %s820_s2  ;;  %247 = vrot.lane.b32.xlu1 %v874_v1, %s821_s3 }
  0x1d   :  { %272 = vrot.lane.b32.xlu0 %v874_v1, %s822_s9 }
  0x24   :  { %197 = vrot.lane.b32.xlu1 %v874_v1, %s823_s10  ;;  %168 = vrot.lane.b32.xlu2 %v882_v2, %s824_s11 }
  0x25   :  { %195 = vrot.lane.b32.xlu0 %v866_v0, %s823_s10 }
  0x2c   :  { %172 = vrot.lane.b32.xlu1 %v874_v1, %s824_s11  ;;  %143 = vrot.lane.b32.xlu2 %v882_v2, %s825_s12 }
  0x2d   :  { %170 = vrot.lane.b32.xlu0 %v866_v0, %s824_s11 }
  0x34   :  { %147 = vrot.lane.b32.xlu1 %v874_v1, %s825_s12  ;;  %266 = vrot.lane.b32.xlu2 %v896_v3, %s822_s9 }
  0x35   :  { %145 = vrot.lane.b32.xlu0 %v866_v0, %s825_s12 }
  0x3c   :  { %118 = vrot.lane.b32.xlu1 %v882_v2, %s826_s13  ;;  %120 = vrot.lane.b32.xlu2 %v866_v0, %s826_s13 }
  0x3d   :  { %268 = vrot.lane.b32.xlu0 %v882_v2, %s822_s9 }
  0x44   :  { %241 = vrot.lane.b32.xlu1 %v896_v3, %s821_s3  ;;  %243 = vrot.lane.b32.xlu2 %v882_v2, %s821_s3 }
  0x45   :  { %122 = vrot.lane.b32.xlu0 %v874_v1, %s826_s13 }
  0x4c   :  { %95 = vrot.lane.b32.xlu1 %v866_v0, %s827_s14  ;;  %97 = vrot.lane.b32.xlu2 %v874_v1, %s827_s14 }
  0x4d   :  { %93 = vrot.lane.b32.xlu0 %v882_v2, %s827_s14 }
  0x54   :  { %218 = vrot.lane.b32.xlu1 %v882_v2, %s820_s2  ;;  %191 = vrot.lane.b32.xlu2 %v896_v3, %s823_s10 }
  0x55   :  { %216 = vrot.lane.b32.xlu0 %v896_v3, %s820_s2 }
  0x5c   :  { %166 = vrot.lane.b32.xlu1 %v896_v3, %s824_s11  ;;  %141 = vrot.lane.b32.xlu2 %v896_v3, %s825_s12 }
  0x5d   :  { %193 = vrot.lane.b32.xlu0 %v882_v2, %s823_s10 }
  0x64   :  { %91 = vrot.lane.b32.xlu1 %v896_v3, %s827_s14 }
  0x65   :  { %116 = vrot.lane.b32.xlu0 %v896_v3, %s826_s13 }
  0x6e   :  { %v938_v4 = vpop.permute.xlu2 %220 }
  0x76   :  { %v223_v5 = vpop.permute.xlu2 %222 }
  0x77   :  { %v232_v20 = vsel %vm224_vm2, %v223_v5, 0.0  ;;  %v227_v28 = vsel %vm224_vm2, %v938_v4, %v223_v5 }
  0x78   :  { %v240_v30 = vmul.f32 %v236_v19, %v232_v20  ;;  %v239_v32 = vmul.f32 %v235_v27, %v227_v28 }
  0x7e   :  { %v940_v6 = vpop.permute.xlu2 %168 }
  0x86   :  { %v942_v7 = vpop.permute.xlu1 %245  ;;  %v955_v15 = vpop.permute.xlu2 %143 }
  0x87   :  { %v944_v8 = vpop.permute.xlu0 %270 }
  0x8e   :  { %v248_v13 = vpop.permute.xlu1 %247  ;;  %v267_v39 = vpop.permute.xlu2 %266 }
  0x8f   :  { %v257_v16 = vsel %vm249_vm0, %v248_v13, 0.0  ;;  %v273_v17 = vpop.permute.xlu0 %272  ;;  %v252_v21 = vsel %vm249_vm0, %v942_v7, %v248_v13 }
  0x90   :  { %v277_v22 = vsel %vm274_vm1, %v944_v8, %v273_v17  ;;  %v282_v23 = vsel %vm274_vm1, %v273_v17, 0.0  ;;  %v265_v26 = vmul.f32 %v261_v12, %v257_v16  ;;  %v264_v29 = vmul.f32 %v260_v18, %v252_v21 }
  0x91   :  { %v289_v24 = vmul.f32 %v948_v10, %v277_v22  ;;  %v290_v25 = vmul.f32 %v950_v11, %v282_v23  ;;  %v259_v16 = vperm.slane %v1010_v58, 7 }
  0x93   :  { %343 = vmatpush.msra.mxu2 %v289_v24  ;;  %363 = vmatpush.msra.mxu3 %v290_v25  ;;  %v1031_v25 = vld [vmem:[#allocation5] sm:$0xff] }
  0x95   :  { %344 = vmatpush.msra.mxu2 %v264_v29  ;;  %364 = vmatpush.msra.mxu3 %v265_v26  ;;  %v258_v26 = vperm.slane %v1031_v25, 7 }
  0x96   :  { %v198_v34 = vpop.permute.xlu1 %197  ;;  %v121_v49 = vpop.permute.xlu2 %120 }
  0x97   :  { %v207_v35 = vsel %vm199_vm3, %v198_v34, 0.0  ;;  %345 = vmatpush.msra.mxu2 %v239_v32  ;;  %v982_v36 = vpop.permute.xlu0 %195  ;;  %365 = vmatpush.msra.mxu3 %v240_v30 }
  0x98   :  { %v202_v37 = vsel %vm199_vm3, %v982_v36, %v198_v34  ;;  %v215_v38 = vmul.f32 %v211_v31, %v207_v35 }
  0x99   :  { %v214_v40 = vmul.f32 %v210_v33, %v202_v37 }
  0x9a   :  { %366 = vmatpush.msra.mxu3 %v215_v38  ;;  %v111_v38 = vperm.slane %v946_v9, 0 }
  0x9b   :  { %346 = vmatpush.msra.mxu2 %v214_v40 }
  0x9c   :  { %367 = vmatpush.msra.mxu3 %v874_v1 }
  0x9d   :  { %347 = vmatpush.msra.mxu2 %v866_v0 }
  0x9e   :  { %v173_v43 = vpop.permute.xlu1 %172  ;;  %v244_v60 = vpop.permute.xlu2 %243 }
  0x9f   :  { %v171_v44 = vpop.permute.xlu0 %170  ;;  %v251_v17 = vsel %vm249_vm0, %v244_v60, %v942_v7 }
  0xa0   :  { %v176_v45 = vsel %vm174_vm4, %v940_v6, %v171_v44  ;;  %v177_v46 = vsel %vm174_vm4, %v171_v44, %v173_v43  ;;  %v263_v7 = vmul.f32 %v259_v16, %v251_v17  ;;  %v209_v17 = vperm.slane %v1010_v58, 5 }
  0xa1   :  { %v189_v47 = vmul.f32 %v185_v41, %v176_v45  ;;  %v190_v48 = vmul.f32 %v186_v42, %v177_v46 }
  0xa3   :  { %348 = vmatpush.msra.mxu2 %v189_v47  ;;  %368 = vmatpush.msra.mxu3 %v190_v48  ;;  %v1051_v48 = vld [vmem:[#allocation7] sm:$0xff] }
  0xa6   :  { %v148_v52 = vpop.permute.xlu1 %147  ;;  %v98_v37 = vpop.permute.xlu2 %97 }
  0xa7   :  { %v146_v53 = vpop.permute.xlu0 %145 }
  0xa8   :  { %v151_v54 = vsel %vm149_vm5, %v955_v15, %v146_v53  ;;  %v152_v55 = vsel %vm149_vm5, %v146_v53, %v148_v52  ;;  %v233_v52 = vperm.slane %v1031_v25, 6 }
  0xa9   :  { %v164_v56 = vmul.f32 %v160_v50, %v151_v54  ;;  %v165_v57 = vmul.f32 %v161_v51, %v152_v55 }
  0xab   :  { %349 = vmatpush.msra.mxu2 %v164_v56  ;;  %369 = vmatpush.msra.mxu3 %v165_v57 }
  0xae   :  { %v1017_v63 = vpop.permute.xlu1 %118  ;;  %v192_v53 = vpop.permute.xlu2 %191 }
  0xaf   :  { %v126_v5 = vsel %vm124_vm6, %v1017_v63, %v121_v49  ;;  %v269_v13 = vpop.permute.xlu0 %268 }
  0xb0   :  { %v275_v20 = vsel %vm274_vm1, %v267_v39, %v269_v13  ;;  %v276_v21 = vsel %vm274_vm1, %v269_v13, %v944_v8  ;;  %v139_v22 = vmul.f32 %v135_v59, %v126_v5  ;;  %v136_v8 = vperm.slane %v946_v9, 1 }
  0xb1   :  { %v287_v23 = vmul.f32 %v1013_v61, %v275_v20  ;;  %v288_v24 = vmul.f32 %v1015_v62, %v276_v21  ;;  %v110_v39 = vperm.slane %v953_v14, 0  ;;  %v208_v13 = vperm.slane %v1031_v25, 5 }
  0xb2   :  { %350 = vmatpush.msra.mxu2 %v139_v22 }
  0xb3   :  { %303 = vmatpush.msra.mxu0 %v287_v23  ;;  %323 = vmatpush.msra.mxu1 %v288_v24  ;;  %v184_v24 = vperm.slane %v1010_v58, 3 }
  0xb5   :  { %324 = vmatpush.msra.mxu1 %v263_v7  ;;  %v158_v7 = vperm.slane %v1031_v25, 2 }
  0xb6   :  { %v242_v28 = vpop.permute.xlu1 %241  ;;  %v142_v22 = vpop.permute.xlu2 %141 }
  0xb7   :  { %v123_v29 = vpop.permute.xlu0 %122  ;;  %v250_v30 = vsel %vm249_vm0, %v242_v28, %v244_v60  ;;  %v157_v28 = vsel %vm149_vm5, 0.0, %v142_v22 }
  0xb8   :  { %v127_v32 = vsel %vm124_vm6, %v121_v49, %v123_v29  ;;  %v262_v34 = vmul.f32 %v258_v26, %v250_v30  ;;  %v234_v49 = vperm.slane %v1010_v58, 6 }
  0xb9   :  { %v140_v35 = vmul.f32 %v136_v8, %v127_v32  ;;  %v183_v32 = vperm.slane %v1031_v25, 3 }
  0xba   :  { %304 = vmatpush.msra.mxu0 %v262_v34 }
  0xbb   :  { %370 = vmatpush.msra.mxu3 %v140_v35 }
  0xbe   :  { %v96_v40 = vpop.permute.xlu1 %95 }
  0xbf   :  { %v94_v43 = vpop.permute.xlu0 %93  ;;  %v102_v44 = vsel %vm99_vm7, %v96_v40, %v98_v37  ;;  %v150_v37 = vsel %vm149_vm5, %v142_v22, %v955_v15 }
  0xc0   :  { %v101_v45 = vsel %vm99_vm7, %v94_v43, %v96_v40  ;;  %v115_v46 = vmul.f32 %v111_v38, %v102_v44  ;;  %v162_v40 = vmul.f32 %v158_v7, %v157_v28  ;;  %v133_v44 = vperm.slane %v1031_v25, 1 }
  0xc1   :  { %v114_v47 = vmul.f32 %v110_v39, %v101_v45 }
  0xc2   :  { %371 = vmatpush.msra.mxu3 %v115_v46  ;;  %v134_v46 = vperm.slane %v1010_v58, 1 }
  0xc3   :  { %351 = vmatpush.msra.mxu2 %v114_v47  ;;  %662 = vmatmul.msk.f32.vlgmr.msra.gmra.mxu3 %vm292_vm8, %v1051_v48  ;;  %v108_v47 = vperm.slane %v1031_v25, 0 }
  0xc4   :  { %661 = vmatmul.msk.f32.vlgmr.msra.gmra.mxu2 %vm292_vm8, %v1051_v48 }
  0xc6   :  { %v219_v54 = vpop.permute.xlu1 %218 }
  0xc7   :  { %v217_v55 = vpop.permute.xlu0 %216  ;;  %v226_v56 = vsel %vm224_vm2, %v219_v54, %v938_v4 }
  0xc8   :  { %v225_v57 = vsel %vm224_vm2, %v217_v55, %v219_v54  ;;  %v238_v60 = vmul.f32 %v234_v49, %v226_v56  ;;  %v109_v56 = vperm.slane %v1010_v58, 0 }
  0xc9   :  { %v237_v5 = vmul.f32 %v233_v52, %v225_v57 }
  0xca   :  { %325 = vmatpush.msra.mxu1 %v238_v60 }
  0xcb   :  { %305 = vmatpush.msra.mxu0 %v237_v5 }
  0xce   :  { %v167_v20 = vpop.permute.xlu1 %166 }
  0xcf   :  { %v194_v21 = vpop.permute.xlu0 %193  ;;  %v175_v34 = vsel %vm174_vm4, %v167_v20, %v940_v6  ;;  %v182_v35 = vsel %vm174_vm4, 0.0, %v167_v20 }
  0xd0   :  { %v200_v23 = vsel %vm199_vm3, %v192_v53, %v194_v21  ;;  %v201_v4 = vsel %vm199_vm3, %v194_v21, %v982_v36  ;;  %v159_v36 = vperm.slane %v1010_v58, 2  ;;  %v187_v6 = vmul.f32 %v183_v32, %v182_v35 }
  0xd1   :  { %v212_v29 = vmul.f32 %v208_v13, %v200_v23  ;;  %v213_v30 = vmul.f32 %v209_v17, %v201_v4  ;;  %v188_v45 = vmul.f32 %v184_v24, %v175_v34 }
  0xd2   :  { %v163_v55 = vmul.f32 %v159_v36, %v150_v37 }
  0xd3   :  { %306 = vmatpush.msra.mxu0 %v212_v29  ;;  %326 = vmatpush.msra.mxu1 %v213_v30 }
  0xd5   :  { %307 = vmatpush.msra.mxu0 %v896_v3  ;;  %327 = vmatpush.msra.mxu1 %v882_v2 }
  0xd6   :  { %v92_v15 = vpop.permute.xlu1 %91 }
  0xd7   :  { %v117_v53 = vpop.permute.xlu0 %116  ;;  %v107_v54 = vsel %vm99_vm7, 0.0, %v92_v15  ;;  %308 = vmatpush.msra.mxu0 %v187_v6  ;;  %328 = vmatpush.msra.mxu1 %v188_v45  ;;  %v100_v5 = vsel %vm99_vm7, %v92_v15, %v94_v43 }
  0xd8   :  { %v125_v57 = vsel %vm124_vm6, %v117_v53, %v1017_v63  ;;  %v132_v60 = vsel %vm124_vm6, 0.0, %v117_v53  ;;  %v112_v22 = vmul.f32 %v108_v47, %v107_v54  ;;  %v113_v63 = vmul.f32 %v109_v56, %v100_v5 }
  0xd9   :  { %309 = vmatpush.msra.mxu0 %v162_v40  ;;  %329 = vmatpush.msra.mxu1 %v163_v55  ;;  %v137_v20 = vmul.f32 %v133_v44, %v132_v60  ;;  %v138_v21 = vmul.f32 %v134_v46, %v125_v57 }
  0xdb   :  { %310 = vmatpush.msra.mxu0 %v137_v20  ;;  %330 = vmatpush.msra.mxu1 %v138_v21 }
  0xdd   :  { %311 = vmatpush.msra.mxu0 %v112_v22  ;;  %331 = vmatpush.msra.mxu1 %v113_v63 }
  0xde   :  { %659 = vmatmul.msk.f32.vlgmr.msra.gmra.mxu0 %vm292_vm8, %v1051_v48  ;;  %660 = vmatmul.msk.f32.vlgmr.msra.gmra.mxu1 %vm292_vm8, %v1051_v48 }
 0x146   :  { %v373_v29 = vpop.f32.mrf.mxu3 }
 0x147   :  { %v353_v48 = vpop.f32.mrf.mxu2  ;;  %v1146_v34 = vmax.f32 %v373_v29, 0.0 }
 0x148   :  { %v1144_v30 = vmax.f32 %v353_v48, 0.0 }
 0x15b   :  { %v313_v43 = vpop.f32.mrf.mxu0  ;;  %v333_v23 = vpop.f32.mrf.mxu1 }
 0x15c   :  { %v1116_v4 = vmax.f32 %v313_v43, 0.0  ;;  %v1118_v28 = vmax.f32 %v333_v23, 0.0 }
 0x15e   :  { %504 = vrot.lane.b32.xlu0 %v1116_v4, %s821_s3  ;;  %524 = vrot.lane.b32.xlu1 %v1116_v4, %s822_s9 }
 0x15f   :  { %526 = vrot.lane.b32.xlu2 %v1118_v28, %s822_s9 }
 0x166   :  { %486 = vrot.lane.b32.xlu0 %v1118_v28, %s820_s2  ;;  %506 = vrot.lane.b32.xlu1 %v1118_v28, %s821_s3 }
 0x167   :  { %446 = vrot.lane.b32.xlu2 %v1118_v28, %s824_s11 }
 0x16e   :  { %406 = vrot.lane.b32.xlu0 %v1118_v28, %s826_s13  ;;  %426 = vrot.lane.b32.xlu1 %v1118_v28, %s825_s12 }
 0x16f   :  { %484 = vrot.lane.b32.xlu2 %v1116_v4, %s820_s2 }
 0x176   :  { %386 = vrot.lane.b32.xlu0 %v1118_v28, %s827_s14  ;;  %464 = vrot.lane.b32.xlu1 %v1116_v4, %s823_s10 }
 0x177   :  { %466 = vrot.lane.b32.xlu2 %v1118_v28, %s823_s10 }
 0x17e   :  { %530 = vrot.lane.b32.xlu0 %v1146_v34, %s822_s9  ;;  %508 = vrot.lane.b32.xlu1 %v1144_v30, %s821_s3 }
 0x17f   :  { %528 = vrot.lane.b32.xlu2 %v1144_v30, %s822_s9 }
 0x186   :  { %488 = vrot.lane.b32.xlu0 %v1144_v30, %s820_s2  ;;  %490 = vrot.lane.b32.xlu1 %v1146_v34, %s820_s2 }
 0x187   :  { %510 = vrot.lane.b32.xlu2 %v1146_v34, %s821_s3 }
 0x18e   :  { %470 = vrot.lane.b32.xlu0 %v1146_v34, %s823_s10  ;;  %450 = vrot.lane.b32.xlu1 %v1146_v34, %s824_s11 }
 0x18f   :  { %468 = vrot.lane.b32.xlu2 %v1144_v30, %s823_s10 }
 0x196   :  { %448 = vrot.lane.b32.xlu0 %v1144_v30, %s824_s11  ;;  %408 = vrot.lane.b32.xlu1 %v1144_v30, %s826_s13 }
 0x197   :  { %428 = vrot.lane.b32.xlu2 %v1144_v30, %s825_s12 }
 0x19e   :  { %430 = vrot.lane.b32.xlu0 %v1146_v34, %s825_s12  ;;  %388 = vrot.lane.b32.xlu1 %v1144_v30, %s827_s14 }
 0x19f   :  { %410 = vrot.lane.b32.xlu2 %v1146_v34, %s826_s13 }
 0x1a6   :  { %444 = vrot.lane.b32.xlu0 %v1116_v4, %s824_s11  ;;  %424 = vrot.lane.b32.xlu1 %v1116_v4, %s825_s12 }
 0x1a7   :  { %390 = vrot.lane.b32.xlu2 %v1146_v34, %s827_s14 }
 0x1ae   :  { %384 = vrot.lane.b32.xlu0 %v1116_v4, %s827_s14 }
 0x1af   :  { %404 = vrot.lane.b32.xlu2 %v1116_v4, %s826_s13 }
 0x1b9   :  { %v527_v35 = vpop.permute.xlu2 %526 }
 0x1c1   :  { %v1188_v37 = vpop.permute.xlu2 %446 }
 0x1c9   :  { %v485_v40 = vpop.permute.xlu2 %484 }
 0x1d0   :  { %v505_v6 = vpop.permute.xlu0 %504  ;;  %v525_v45 = vpop.permute.xlu1 %524 }
 0x1d1   :  { %v532_v15 = vsel %vm274_vm1, %v525_v45, %v527_v35  ;;  %v467_v53 = vpop.permute.xlu2 %466 }
 0x1d2   :  { %v540_v54 = vmul.f32 %v1013_v61, %v532_v15 }
 0x1d4   :  { %555 = vmatpush.msrb.mxu0 %v540_v54 }
 0x1d8   :  { %v487_v55 = vpop.permute.xlu0 %486  ;;  %v507_v57 = vpop.permute.xlu1 %506 }
 0x1d9   :  { %v492_v60 = vsel %vm224_vm2, %v485_v40, %v487_v55  ;;  %v512_v5 = vsel %vm249_vm0, %v505_v6, %v507_v57  ;;  %v529_v20 = vpop.permute.xlu2 %528 }
 0x1da   :  { %v533_v21 = vsel %vm274_vm1, %v527_v35, %v529_v20  ;;  %v520_v22 = vmul.f32 %v512_v5, %v258_v26  ;;  %v500_v43 = vmul.f32 %v492_v60, %v233_v52 }
 0x1db   :  { %v541_v63 = vmul.f32 %v1015_v62, %v533_v21 }
 0x1dc   :  { %556 = vmatpush.msrb.mxu0 %v520_v22 }
 0x1dd   :  { %575 = vmatpush.msrb.mxu1 %v541_v63 }
 0x1de   :  { %557 = vmatpush.msrb.mxu0 %v500_v43 }
 0x1e0   :  { %v1200_v61 = vpop.permute.xlu0 %406  ;;  %v1202_v23 = vpop.permute.xlu1 %426 }
 0x1e1   :  { %v511_v48 = vpop.permute.xlu2 %510 }
 0x1e2   :  { %v519_v5 = vsel %vm249_vm0, %v511_v48, 0.0 }
 0x1e8   :  { %v1204_v29 = vpop.permute.xlu0 %386  ;;  %v465_v40 = vpop.permute.xlu1 %464 }
 0x1e9   :  { %v472_v35 = vsel %vm199_vm3, %v465_v40, %v467_v53  ;;  %v469_v62 = vpop.permute.xlu2 %468 }
 0x1ea   :  { %v480_v26 = vmul.f32 %v472_v35, %v208_v13  ;;  %v473_v43 = vsel %vm199_vm3, %v467_v53, %v469_v62 }
 0x1eb   :  { %v481_v53 = vmul.f32 %v473_v43, %v209_v17 }
 0x1ec   :  { %558 = vmatpush.msrb.mxu0 %v480_v26 }
 0x1ee   :  { %559 = vmatpush.msrb.mxu0 %v1116_v4 }
 0x1f0   :  { %v531_v52 = vpop.permute.xlu0 %530  ;;  %v509_v6 = vpop.permute.xlu1 %508 }
 0x1f1   :  { %v534_v45 = vsel %vm274_vm1, %v529_v20, %v531_v52  ;;  %v539_v15 = vsel %vm274_vm1, %v531_v52, 0.0  ;;  %v513_v54 = vsel %vm249_vm0, %v507_v57, %v509_v6  ;;  %v514_v60 = vsel %vm249_vm0, %v509_v6, %v511_v48 }
 0x1f2   :  { %v521_v21 = vmul.f32 %v513_v54, %v259_v16  ;;  %v542_v13 = vmul.f32 %v948_v10, %v534_v45  ;;  %v543_v4 = vmul.f32 %v950_v11, %v539_v15  ;;  %v522_v20 = vmul.f32 %v514_v60, %v260_v18  ;;  %v429_v16 = vpop.permute.xlu2 %428 }
 0x1f3   :  { %v523_v57 = vmul.f32 %v519_v5, %v261_v12 }
 0x1f4   :  { %576 = vmatpush.msrb.mxu1 %v521_v21  ;;  %595 = vmatpush.msrb.mxu2 %v542_v13 }
 0x1f5   :  { %615 = vmatpush.msrb.mxu3 %v543_v4  ;;  %v544_v4 = vld [vmem:[#allocation8] sm:$0xff] }
 0x1f6   :  { %596 = vmatpush.msrb.mxu2 %v522_v20 }
 0x1f7   :  { %616 = vmatpush.msrb.mxu3 %v523_v57 }
 0x1f8   :  { %v489_v22 = vpop.permute.xlu0 %488  ;;  %v491_v63 = vpop.permute.xlu1 %490 }
 0x1f9   :  { %v493_v10 = vsel %vm224_vm2, %v487_v55, %v489_v22  ;;  %v494_v11 = vsel %vm224_vm2, %v489_v22, %v491_v63  ;;  %v499_v48 = vsel %vm224_vm2, %v491_v63, 0.0 }
 0x1fa   :  { %v501_v18 = vmul.f32 %v493_v10, %v234_v49  ;;  %v502_v40 = vmul.f32 %v494_v11, %v235_v27  ;;  %v503_v12 = vmul.f32 %v499_v48, %v236_v19  ;;  %v411_v52 = vpop.permute.xlu2 %410 }
 0x1fc   :  { %577 = vmatpush.msrb.mxu1 %v501_v18  ;;  %597 = vmatpush.msrb.mxu2 %v502_v40 }
 0x1fd   :  { %617 = vmatpush.msrb.mxu3 %v503_v12 }
 0x1fe   :  { %578 = vmatpush.msrb.mxu1 %v481_v53 }
 0x200   :  { %v471_v55 = vpop.permute.xlu0 %470  ;;  %v451_v35 = vpop.permute.xlu1 %450  ;;  %579 = vmatpush.msrb.mxu1 %v1118_v28  ;;  %v433_v28 = vsel %vm149_vm5, %v1202_v23, %v429_v16 }
 0x201   :  { %v474_v26 = vsel %vm199_vm3, %v469_v62, %v471_v55  ;;  %v479_v49 = vsel %vm199_vm3, %v471_v55, 0.0 }
 0x202   :  { %v482_v27 = vmul.f32 %v474_v26, %v210_v33  ;;  %v483_v19 = vmul.f32 %v479_v49, %v211_v31  ;;  %v391_v15 = vpop.permute.xlu2 %390 }
 0x204   :  { %598 = vmatpush.msrb.mxu2 %v482_v27  ;;  %618 = vmatpush.msrb.mxu3 %v483_v19 }
 0x206   :  { %599 = vmatpush.msrb.mxu2 %v1144_v30  ;;  %619 = vmatpush.msrb.mxu3 %v1146_v34  ;;  %v442_v34 = vmul.f32 %v433_v28, %v160_v50 }
 0x208   :  { %v449_v17 = vpop.permute.xlu0 %448  ;;  %v409_v6 = vpop.permute.xlu1 %408 }
 0x209   :  { %v453_v62 = vsel %vm174_vm4, %v1188_v37, %v449_v17  ;;  %v454_v33 = vsel %vm174_vm4, %v449_v17, %v451_v35  ;;  %v413_v30 = vsel %vm124_vm6, %v1200_v61, %v409_v6 }
 0x20a   :  { %v462_v31 = vmul.f32 %v453_v62, %v185_v41  ;;  %v463_v45 = vmul.f32 %v454_v33, %v186_v42  ;;  %v422_v54 = vmul.f32 %v413_v30, %v135_v59  ;;  %v414_v41 = vsel %vm124_vm6, %v409_v6, %v411_v52  ;;  %v405_v22 = vpop.permute.xlu2 %404 }
 0x20b   :  { %v423_v59 = vmul.f32 %v414_v41, %v136_v8 }
 0x20c   :  { %600 = vmatpush.msrb.mxu2 %v462_v31  ;;  %620 = vmatpush.msrb.mxu3 %v463_v45 }
 0x20e   :  { %601 = vmatpush.msrb.mxu2 %v442_v34 }
 0x210   :  { %v431_v60 = vpop.permute.xlu0 %430  ;;  %v389_v5 = vpop.permute.xlu1 %388  ;;  %602 = vmatpush.msrb.mxu2 %v422_v54 }
 0x211   :  { %v434_v42 = vsel %vm149_vm5, %v429_v16, %v431_v60  ;;  %v393_v21 = vsel %vm99_vm7, %v1204_v29, %v389_v5  ;;  %v394_v20 = vsel %vm99_vm7, %v389_v5, %v391_v15  ;;  %v412_v16 = vsel %vm124_vm6, %v405_v22, %v1200_v61 }
 0x212   :  { %v402_v13 = vmul.f32 %v393_v21, %v110_v39  ;;  %v443_v50 = vmul.f32 %v434_v42, %v161_v51  ;;  %v403_v57 = vmul.f32 %v394_v20, %v111_v38 }
 0x214   :  { %603 = vmatpush.msrb.mxu2 %v402_v13  ;;  %621 = vmatpush.msrb.mxu3 %v443_v50 }
 0x215   :  { %665 = vmatmul.msk.f32.vlgmr.msrb.gmra.mxu2 %vm292_vm8, %v544_v4 }
 0x216   :  { %622 = vmatpush.msrb.mxu3 %v423_v59 }
 0x218   :  { %v445_v14 = vpop.permute.xlu0 %444  ;;  %v425_v39 = vpop.permute.xlu1 %424  ;;  %623 = vmatpush.msrb.mxu3 %v403_v57 }
 0x219   :  { %v452_v51 = vsel %vm174_vm4, %v445_v14, %v1188_v37  ;;  %v459_v63 = vsel %vm174_vm4, 0.0, %v445_v14  ;;  %v432_v43 = vsel %vm149_vm5, %v425_v39, %v1202_v23  ;;  %v439_v8 = vsel %vm149_vm5, 0.0, %v425_v39  ;;  %666 = vmatmul.msk.f32.vlgmr.msrb.gmra.mxu3 %vm292_vm8, %v544_v4 }
 0x21a   :  { %v460_v9 = vmul.f32 %v459_v63, %v183_v32  ;;  %v461_v38 = vmul.f32 %v452_v51, %v184_v24  ;;  %v419_v37 = vsel %vm124_vm6, 0.0, %v405_v22  ;;  %v440_v23 = vmul.f32 %v439_v8, %v158_v7 }
 0x21b   :  { %v441_v10 = vmul.f32 %v432_v43, %v159_v36  ;;  %v420_v32 = vmul.f32 %v419_v37, %v133_v44  ;;  %v421_v24 = vmul.f32 %v412_v16, %v134_v46 }
 0x21c   :  { %560 = vmatpush.msrb.mxu0 %v460_v9  ;;  %580 = vmatpush.msrb.mxu1 %v461_v38 }
 0x21e   :  { %561 = vmatpush.msrb.mxu0 %v440_v23  ;;  %581 = vmatpush.msrb.mxu1 %v441_v10 }
 0x220   :  { %v385_v11 = vpop.permute.xlu0 %384  ;;  %562 = vmatpush.msrb.mxu0 %v420_v32  ;;  %582 = vmatpush.msrb.mxu1 %v421_v24 }
 0x221   :  { %v392_v61 = vsel %vm99_vm7, %v385_v11, %v1204_v29  ;;  %v399_v48 = vsel %vm99_vm7, 0.0, %v385_v11 }
 0x222   :  { %v400_v7 = vmul.f32 %v399_v48, %v108_v47  ;;  %v401_v36 = vmul.f32 %v392_v61, %v109_v56 }
 0x224   :  { %563 = vmatpush.msrb.mxu0 %v400_v7  ;;  %583 = vmatpush.msrb.mxu1 %v401_v36 }
 0x225   :  { %663 = vmatmul.msk.f32.vlgmr.msrb.gmra.mxu0 %vm292_vm8, %v544_v4  ;;  %664 = vmatmul.msk.f32.vlgmr.msrb.gmra.mxu1 %vm292_vm8, %v544_v4 }
 0x298   :  { %v605_v44 = vpop.f32.mrf.mxu2 }
 0x299   :  { %v630_v46 = vmax.f32 %v605_v44, 0.0 }
 0x29b   :  { %v634_v18 = vadd.f32 %v630_v46, %v866_v0 }
 0x29c   :  { %v625_v40 = vpop.f32.mrf.mxu3 }
 0x29d   :  { %638 = vst [vmem:[#allocation10 + $0x10] sm:$0xff] %v634_v18  ;;  %v631_v29 = vmax.f32 %v625_v40, 0.0 }
 0x29f   :  { %v635_v12 = vadd.f32 %v631_v29, %v874_v1 }
 0x2a1   :  { %639 = vst [vmem:[#allocation10 + $0x18] sm:$0xff] %v635_v12 }
 0x2a2   :  { %v565_v25 = vpop.f32.mrf.mxu0  ;;  %v585_v47 = vpop.f32.mrf.mxu1 }
 0x2a3   :  { %v628_v58 = vmax.f32 %v565_v25, 0.0  ;;  %v629_v56 = vmax.f32 %v585_v47, 0.0 }
 0x2a5   :  { %v632_v53 = vadd.f32 %v628_v58, %v896_v3  ;;  %v633_v0 = vadd.f32 %v629_v56, %v882_v2 }
 0x2a7   :  { %636 = vst [vmem:[#allocation10] sm:$0xff] %v632_v53 }
 0x2a8   :  { %637 = vst [vmem:[#allocation10 + $0x8] sm:$0xff] %v633_v0 }
 0x2a9   :  { %650 = dma.vmem_to_hbm [thread:$0]  %s646_s16, 512, %s648_s19, [#allocation4]  }
 0x2aa   :  { %812 = dma.done.wait [#allocation4], 512  }
 0x2ab   :  { %813 = vsyncadd [#allocation4], 4294966784 }
 0x2ac   :  { %655 = vsyncpa [#allocation3], 1 }
 0x2ad   :  { %656 = vsyncpa [#allocation6], 1 }
 0x2ae   :  { %657 = vsyncpa [#allocation9], 1 }
 0x2af   :  { %658 = vsyncpa [#allocation4], 1 }

</bundles_post_ra>
